<compile_context>
chip_gen: v6e
topology: v6e:2x2x1
jax: 0.10.0
libtpu: 0.0.40
codegen_flags: <defaults>
</compile_context>

<pallas_src>
import jax
import jax.numpy as jnp
import numpy as np
from jax.experimental import pallas as pl
from jax.experimental.pallas import tpu as pltpu

# ----------------------------- configuration -------------------------------
B = 2                 # batch size
Q = 8                 # number of queries / feature positions
NUM_CLASSES = 1       # single object tracking (always 1 for TransT)
C1 = NUM_CLASSES + 1  # logits dim (object + no-object)
EOS_COEF = 0.0625     # no-object class weight
N_MATCHED = B         # one matched (query, gt) pair per batch element
NUM_BOXES = float(max(N_MATCHED, 1))        # torch.clamp(num_boxes, min=1)
INV_NUM_BOXES = 1.0 / NUM_BOXES
INV_NUM_MATCHED = 1.0 / float(N_MATCHED)

LANES = 128           # lane-dense slab width
NQ = B * Q            # slab rows (multiple of 8)

# lane layout inside the slab
_L0, _L1 = 0, 1       # logits columns
_SB = 2               # predicted box: lanes 2..5  (cx, cy, w, h)
_IOUH = 6             # predicted iou-head value
_TB = 7               # target box:    lanes 7..10 (cx, cy, w, h)
_ROW_W = 11           # used lanes per row

OUT_NAMES = ("loss_ce", "class_error", "loss_bbox", "loss_giou", "iou", "loss_iouh")

assert NUM_CLASSES == 1, "2-class column arithmetic in the kernel assumes C+1 == 2"


# ------------------------------- Pallas kernel ------------------------------
def set_criterion_kernel(meta_ref, slab_ref, out_ref):
    """meta_ref : SMEM int32 (8,)  = [flat_idx_0..flat_idx_{N-1}, label_0..label_{N-1}, 0...]
       slab_ref : VMEM f32  (NQ, 128) packed per the layout above
       out_ref  : SMEM f32  (8,)    = [loss_ce, class_error, loss_bbox, loss_giou, iou, loss_iouh, 0, 0]
    """
    f32 = jnp.float32

    slab = slab_ref[...]                                  # one unmasked VMEM load
    l0 = slab[:, _L0:_L0 + 1]
    l1 = slab[:, _L1:_L1 + 1]
    s_cx = slab[:, _SB + 0:_SB + 1]
    s_cy = slab[:, _SB + 1:_SB + 2]
    s_w  = slab[:, _SB + 2:_SB + 3]
    s_h  = slab[:, _SB + 3:_SB + 4]
    siouh = slab[:, _IOUH:_IOUH + 1]
    t_cx = slab[:, _TB + 0:_TB + 1]
    t_cy = slab[:, _TB + 1:_TB + 2]
    t_w  = slab[:, _TB + 2:_TB + 3]
    t_h  = slab[:, _TB + 3:_TB + 4]

    # ---- rebuild target_classes + matched mask from the matcher indices ----
    row = jax.lax.broadcasted_iota(jnp.int32, (NQ, 1), 0)
    tcls = jnp.full((NQ, 1), NUM_CLASSES, dtype=jnp.int32)
    matched = jnp.zeros((NQ, 1), dtype=jnp.bool_)
    for n in range(N_MATCHED):                            # N_MATCHED is tiny/static
        hit = row == meta_ref[n]
        tcls = jnp.where(hit, meta_ref[N_MATCHED + n], tcls)
        matched = jnp.logical_or(matched, hit)
    mfp = matched.astype(f32)                             # reused f32 mask column

    # ---------------- loss_labels: weighted cross-entropy -------------------
    # 2-class logsumexp with no cross-lane reduce / iota / one-hot.
    lse = jnp.maximum(l0, l1) + jnp.log1p(jnp.exp(-jnp.abs(l0 - l1)))
    logit_t = jnp.where(tcls == 0, l0, l1)                # classes are {0, 1}
    nll = lse - logit_t                                   # (NQ, 1)
    w = jnp.where(tcls == NUM_CLASSES, f32(EOS_COEF), f32(1.0))
    loss_ce = jnp.sum(w * nll) / jnp.sum(w)               # data-dependent denom: exact

    # ---------------- class_error = 100 - accuracy over matched rows --------
    pred_cls = (l1 > l0).astype(jnp.int32)                # ties -> class 0 (torch argmax)
    correct = mfp * (pred_cls == tcls).astype(f32)
    class_error = 100.0 - 100.0 * jnp.sum(correct) * INV_NUM_MATCHED

    # ---------------- box losses (row-wise for all queries, masked) ---------
    l1_row = (jnp.abs(s_cx - t_cx) + jnp.abs(s_cy - t_cy)
              + jnp.abs(s_w - t_w) + jnp.abs(s_h - t_h))
    loss_bbox = jnp.sum(mfp * l1_row) * INV_NUM_BOXES

    # cxcywh -> xyxy
    s_x0 = s_cx - 0.5 * s_w; s_x1 = s_cx + 0.5 * s_w
    s_y0 = s_cy - 0.5 * s_h; s_y1 = s_cy + 0.5 * s_h
    t_x0 = t_cx - 0.5 * t_w; t_x1 = t_cx + 0.5 * t_w
    t_y0 = t_cy - 0.5 * t_h; t_y1 = t_cy + 0.5 * t_h

    area_s = (s_x1 - s_x0) * (s_y1 - s_y0)
    area_t = (t_x1 - t_x0) * (t_y1 - t_y0)
    iw = jnp.maximum(jnp.minimum(s_x1, t_x1) - jnp.maximum(s_x0, t_x0), 0.0)
    ih = jnp.maximum(jnp.minimum(s_y1, t_y1) - jnp.maximum(s_y0, t_y0), 0.0)
    inter = iw * ih
    union = area_s + area_t - inter
    iou = inter / union                                   # unmatched rows discarded below
    ew = jnp.maximum(jnp.maximum(s_x1, t_x1) - jnp.minimum(s_x0, t_x0), 0.0)
    eh = jnp.maximum(jnp.maximum(s_y1, t_y1) - jnp.minimum(s_y0, t_y0), 0.0)
    enc = ew * eh
    giou = iou - (enc - union) / enc

    loss_giou = jnp.sum(mfp * (1.0 - giou)) * INV_NUM_BOXES
    iou_mean = jnp.sum(mfp * iou) * INV_NUM_BOXES

    # ---------------- loss_iouh ----------------------------------------------
    iouh_term = (1.0 - iou) ** 2 * (siouh - iou) ** 2
    loss_iouh = jnp.sum(mfp * iouh_term) * INV_NUM_MATCHED

    # ---------------- emit 6 scalars to SMEM output --------------------------
    out_ref[0] = loss_ce
    out_ref[1] = class_error
    out_ref[2] = loss_bbox
    out_ref[3] = loss_giou
    out_ref[4] = iou_mean
    out_ref[5] = loss_iouh
    out_ref[6] = f32(0.0)
    out_ref[7] = f32(0.0)


def set_criterion_pallas(meta, slab):
    out = pl.pallas_call(
        set_criterion_kernel,
        out_shape=jax.ShapeDtypeStruct((8,), jnp.float32),
        in_specs=[pl.BlockSpec(memory_space=pltpu.MemorySpace.SMEM),   # matcher meta
                  pl.BlockSpec(memory_space=pltpu.MemorySpace.VMEM)],  # packed slab
        out_specs=pl.BlockSpec(memory_space=pltpu.MemorySpace.SMEM),
        cost_estimate=pl.CostEstimate(flops=2048, transcendentals=32,
                                      bytes_accessed=NQ * LANES * 4 + 8 * 4 + 8 * 4),
    )(meta, slab)
    return {name: out[i] for i, name in enumerate(OUT_NAMES)}


# ----------------------- host-side packing (layout only) --------------------
def pack_inputs(pred_logits, pred_boxes, pred_iouh, tgt_boxes, tgt_labels,
                src_idx, batch_idx):
    """Reshape/concat/pad only — no gather/scatter; one lane-dense f32 slab +
    a tiny int32 meta vector for SMEM."""
    logits_flat = pred_logits.reshape(NQ, C1).astype(jnp.float32)
    boxes_flat = pred_boxes.reshape(NQ, 4).astype(jnp.float32)
    iouh_flat = pred_iouh.reshape(NQ, 1).astype(jnp.float32)
    tgt_rep = jnp.broadcast_to(tgt_boxes[:, None, :].astype(jnp.float32),
                               (B, Q, 4)).reshape(NQ, 4)
    rows = jnp.concatenate([logits_flat, boxes_flat, iouh_flat, tgt_rep], axis=-1)
    slab = jnp.pad(rows, ((0, 0), (0, LANES - rows.shape[1])))

    flat_idx = (batch_idx * Q + src_idx).astype(jnp.int32)
    meta = jnp.zeros((8,), jnp.int32)
    meta = meta.at[0:N_MATCHED].set(flat_idx)
    meta = meta.at[N_MATCHED:2 * N_MATCHED].set(tgt_labels.astype(jnp.int32))
    return meta, slab


# ------------------------------- JAX reference ------------------------------
def set_criterion_ref(logits, tcls, mlogits, mlabels, sboxes, tboxes, siouh):
    logits = logits.astype(jnp.float32)
    t = tcls[:, 0]
    lse = jax.scipy.special.logsumexp(logits, axis=-1)
    nll = lse - jnp.take_along_axis(logits, tcls, axis=-1)[:, 0]
    w = jnp.where(t == NUM_CLASSES, EOS_COEF, 1.0)
    loss_ce = jnp.sum(w * nll) / jnp.sum(w)

    pred = jnp.argmax(mlogits, axis=-1)
    acc = 100.0 * jnp.mean((pred == mlabels[:, 0]).astype(jnp.float32))
    class_error = 100.0 - acc

    loss_bbox = jnp.sum(jnp.abs(sboxes - tboxes)) / NUM_BOXES

    def to_xyxy(b):
        return jnp.stack([b[:, 0] - b[:, 2] / 2, b[:, 1] - b[:, 3] / 2,
                          b[:, 0] + b[:, 2] / 2, b[:, 1] + b[:, 3] / 2], axis=-1)
    s, tt = to_xyxy(sboxes), to_xyxy(tboxes)
    area_s = (s[:, 2] - s[:, 0]) * (s[:, 3] - s[:, 1])
    area_t = (tt[:, 2] - tt[:, 0]) * (tt[:, 3] - tt[:, 1])
    iw = jnp.clip(jnp.minimum(s[:, 2], tt[:, 2]) - jnp.maximum(s[:, 0], tt[:, 0]), 0)
    ih = jnp.clip(jnp.minimum(s[:, 3], tt[:, 3]) - jnp.maximum(s[:, 1], tt[:, 1]), 0)
    inter = iw * ih
    union = area_s + area_t - inter
    iou = inter / union
    ew = jnp.clip(jnp.maximum(s[:, 2], tt[:, 2]) - jnp.minimum(s[:, 0], tt[:, 0]), 0)
    eh = jnp.clip(jnp.maximum(s[:, 3], tt[:, 3]) - jnp.minimum(s[:, 1], tt[:, 1]), 0)
    enc = ew * eh
    giou = iou - (enc - union) / enc

    loss_giou = jnp.sum(1.0 - giou) / NUM_BOXES
    iou_mean = jnp.sum(iou) / NUM_BOXES
    loss_iouh = jnp.mean((1.0 - iou) ** 2 * (siouh[:, 0] - iou) ** 2)
    return {"loss_ce": loss_ce, "class_error": class_error, "loss_bbox": loss_bbox,
            "loss_giou": loss_giou, "iou": iou_mean, "loss_iouh": loss_iouh}


# ----------------------------------- main ------------------------------------
if __name__ == "__main__":
    key = jax.random.PRNGKey(0)
    k1, k2, k3, k4, k5 = jax.random.split(key, 5)

    # Model outputs
    pred_logits = jax.random.normal(k1, (B, Q, C1), dtype=jnp.float32)
    cxy = jax.random.uniform(k2, (B, Q, 2), minval=0.3, maxval=0.7)
    wh = jax.random.uniform(k3, (B, Q, 2), minval=0.1, maxval=0.4)
    pred_boxes = jnp.concatenate([cxy, wh], axis=-1)            # (B, Q, 4) cxcywh
    pred_iouh = jax.nn.sigmoid(jax.random.normal(k4, (B, Q, 1)))

    # Targets: one gt box / label per batch element (single object tracking)
    tgt_labels = jnp.zeros((B,), dtype=jnp.int32)               # class 0
    tcxy = jax.random.uniform(k5, (B, 2), minval=0.3, maxval=0.7)
    twh = jax.random.uniform(jax.random.fold_in(k5, 1), (B, 2), minval=0.1, maxval=0.4)
    tgt_boxes = jnp.concatenate([tcxy, twh], axis=-1)           # (B, 4)

    # TODO(synk): the real Hungarian/TransT matcher is an external module; its
    # assignment is supplied here as fixed (batch_idx, src_idx) indices.
    src_idx = jnp.array([3, 5], dtype=jnp.int32)
    batch_idx = jnp.arange(B, dtype=jnp.int32)

    # ---- pack once (layout plumbing only) and run the kernel ----
    meta, slab = pack_inputs(pred_logits, pred_boxes, pred_iouh,
                             tgt_boxes, tgt_labels, src_idx, batch_idx)
    losses = set_criterion_pallas(meta, slab)
    losses = {k: jax.block_until_ready(v) for k, v in losses.items()}

    # ---- pure-JAX reference (gather/scatter done host-side, for the check) ----
    target_classes = jnp.full((B, Q), NUM_CLASSES, dtype=jnp.int32)
    target_classes = target_classes.at[batch_idx, src_idx].set(tgt_labels)
    logits_flat = pred_logits.reshape(NQ, C1)
    tcls_flat = target_classes.reshape(NQ, 1)
    matched_logits = pred_logits[batch_idx, src_idx]            # (N, C1)
    matched_labels = tgt_labels.reshape(N_MATCHED, 1)
    src_boxes = pred_boxes[batch_idx, src_idx]                  # (N, 4)
    src_iouh = pred_iouh[batch_idx, src_idx]                    # (N, 1)
    ref = set_criterion_ref(logits_flat, tcls_flat, matched_logits,
                            matched_labels, src_boxes, tgt_boxes, src_iouh)

    for name in OUT_NAMES:
        np.testing.assert_allclose(np.asarray(losses[name]), np.asarray(ref[name]),
                                   rtol=1e-5, atol=1e-5)

    print("KERNEL_OK")
</pallas_src>

<mosaic_0001>
module attributes {stable_mosaic.version = 11 : i64} {
  func.func @set_criterion_kernel(%arg0: memref<8xi32, #tpu.memory_space<smem>>, %arg1: memref<16x128xf32, #tpu.memory_space<vmem>>, %arg2: memref<8xf32, #tpu.memory_space<smem>>) attributes {dimension_semantics = [], scalar_prefetch = 0 : i64, scratch_operands = 0 : i64, tpu.core_type = #tpu.core_type<tc>} {
    %c0 = arith.constant 0 : index
    %c0_0 = arith.constant 0 : index
    %0 = vector.load %arg1[%c0, %c0_0] : memref<16x128xf32, #tpu.memory_space<vmem>>, vector<16x128xf32>
    %1 = vector.extract_strided_slice %0 {offsets = [0, 0], sizes = [16, 1], strides = [1, 1]} : vector<16x128xf32> to vector<16x1xf32>
    %2 = vector.extract_strided_slice %0 {offsets = [0, 1], sizes = [16, 1], strides = [1, 1]} : vector<16x128xf32> to vector<16x1xf32>
    %3 = vector.extract_strided_slice %0 {offsets = [0, 2], sizes = [16, 1], strides = [1, 1]} : vector<16x128xf32> to vector<16x1xf32>
    %4 = vector.extract_strided_slice %0 {offsets = [0, 3], sizes = [16, 1], strides = [1, 1]} : vector<16x128xf32> to vector<16x1xf32>
    %5 = vector.extract_strided_slice %0 {offsets = [0, 4], sizes = [16, 1], strides = [1, 1]} : vector<16x128xf32> to vector<16x1xf32>
    %6 = vector.extract_strided_slice %0 {offsets = [0, 5], sizes = [16, 1], strides = [1, 1]} : vector<16x128xf32> to vector<16x1xf32>
    %7 = vector.extract_strided_slice %0 {offsets = [0, 6], sizes = [16, 1], strides = [1, 1]} : vector<16x128xf32> to vector<16x1xf32>
    %8 = vector.extract_strided_slice %0 {offsets = [0, 7], sizes = [16, 1], strides = [1, 1]} : vector<16x128xf32> to vector<16x1xf32>
    %9 = vector.extract_strided_slice %0 {offsets = [0, 8], sizes = [16, 1], strides = [1, 1]} : vector<16x128xf32> to vector<16x1xf32>
    %10 = vector.extract_strided_slice %0 {offsets = [0, 9], sizes = [16, 1], strides = [1, 1]} : vector<16x128xf32> to vector<16x1xf32>
    %11 = vector.extract_strided_slice %0 {offsets = [0, 10], sizes = [16, 1], strides = [1, 1]} : vector<16x128xf32> to vector<16x1xf32>
    %12 = tpu.iota {dimensions = array<i32: 0>} : vector<16x1xi32>
    %c1_i32 = arith.constant 1 : i32
    %13 = vector.broadcast %c1_i32 : i32 to vector<16x1xi32>
    %false = arith.constant false
    %14 = vector.broadcast %false : i1 to vector<16x1xi1>
    %c0_1 = arith.constant 0 : index
    %15 = memref.load %arg0[%c0_1] : memref<8xi32, #tpu.memory_space<smem>>
    %16 = vector.broadcast %15 : i32 to vector<16x1xi32>
    %17 = arith.cmpi eq, %12, %16 : vector<16x1xi32>
    %c2 = arith.constant 2 : index
    %18 = memref.load %arg0[%c2] : memref<8xi32, #tpu.memory_space<smem>>
    %19 = vector.broadcast %18 : i32 to vector<16x1xi32>
    %20 = arith.select %17, %19, %13 : vector<16x1xi1>, vector<16x1xi32>
    %21 = arith.ori %14, %17 : vector<16x1xi1>
    %c1 = arith.constant 1 : index
    %22 = memref.load %arg0[%c1] : memref<8xi32, #tpu.memory_space<smem>>
    %23 = vector.broadcast %22 : i32 to vector<16x1xi32>
    %24 = arith.cmpi eq, %12, %23 : vector<16x1xi32>
    %c3 = arith.constant 3 : index
    %25 = memref.load %arg0[%c3] : memref<8xi32, #tpu.memory_space<smem>>
    %26 = vector.broadcast %25 : i32 to vector<16x1xi32>
    %27 = arith.select %24, %26, %20 : vector<16x1xi1>, vector<16x1xi32>
    %28 = arith.ori %21, %24 : vector<16x1xi1>
    %29 = arith.extui %28 : vector<16x1xi1> to vector<16x1xi32>
    %30 = arith.sitofp %29 : vector<16x1xi32> to vector<16x1xf32>
    %31 = arith.maximumf %1, %2 : vector<16x1xf32>
    %32 = arith.subf %1, %2 : vector<16x1xf32>
    %33 = math.absf %32 : vector<16x1xf32>
    %cst = arith.constant 0.000000e+00 : f32
    %34 = vector.broadcast %cst : f32 to vector<16x1xf32>
    %35 = arith.subf %34, %33 : vector<16x1xf32>
    %36 = math.exp %35 : vector<16x1xf32>
    %37 = math.log1p %36 : vector<16x1xf32>
    %38 = arith.addf %31, %37 : vector<16x1xf32>
    %c0_i32 = arith.constant 0 : i32
    %39 = vector.broadcast %c0_i32 : i32 to vector<16x1xi32>
    %40 = arith.cmpi eq, %27, %39 : vector<16x1xi32>
    %41 = arith.select %40, %1, %2 : vector<16x1xi1>, vector<16x1xf32>
    %42 = arith.subf %38, %41 : vector<16x1xf32>
    %c1_i32_2 = arith.constant 1 : i32
    %43 = vector.broadcast %c1_i32_2 : i32 to vector<16x1xi32>
    %44 = arith.cmpi eq, %27, %43 : vector<16x1xi32>
    %cst_3 = arith.constant 6.250000e-02 : f32
    %cst_4 = arith.constant 1.000000e+00 : f32
    %45 = vector.broadcast %cst_3 : f32 to vector<16x1xf32>
    %46 = vector.broadcast %cst_4 : f32 to vector<16x1xf32>
    %47 = arith.select %44, %45, %46 : vector<16x1xi1>, vector<16x1xf32>
    %48 = arith.mulf %47, %42 : vector<16x1xf32>
    %49 = vector.shape_cast %48 : vector<16x1xf32> to vector<1x16x1xf32>
    %cst_5 = arith.constant dense<0.000000e+00> : vector<1xf32>
    %50 = vector.multi_reduction <add>, %49, %cst_5 [1, 2] : vector<1x16x1xf32> to vector<1xf32>
    %51 = vector.shape_cast %50 : vector<1xf32> to vector<1x1x1xf32>
    %52 = vector.extract %51[0, 0, 0] : f32 from vector<1x1x1xf32>
    %53 = vector.shape_cast %47 : vector<16x1xf32> to vector<1x16x1xf32>
    %cst_6 = arith.constant dense<0.000000e+00> : vector<1xf32>
    %54 = vector.multi_reduction <add>, %53, %cst_6 [1, 2] : vector<1x16x1xf32> to vector<1xf32>
    %55 = vector.shape_cast %54 : vector<1xf32> to vector<1x1x1xf32>
    %56 = vector.extract %55[0, 0, 0] : f32 from vector<1x1x1xf32>
    %57 = arith.divf %52, %56 : f32
    %58 = arith.cmpf ogt, %2, %1 : vector<16x1xf32>
    %59 = arith.extui %58 : vector<16x1xi1> to vector<16x1xi32>
    %60 = arith.cmpi eq, %59, %27 : vector<16x1xi32>
    %61 = arith.extui %60 : vector<16x1xi1> to vector<16x1xi32>
    %62 = arith.sitofp %61 : vector<16x1xi32> to vector<16x1xf32>
    %63 = arith.mulf %30, %62 : vector<16x1xf32>
    %64 = vector.shape_cast %63 : vector<16x1xf32> to vector<1x16x1xf32>
    %cst_7 = arith.constant dense<0.000000e+00> : vector<1xf32>
    %65 = vector.multi_reduction <add>, %64, %cst_7 [1, 2] : vector<1x16x1xf32> to vector<1xf32>
    %66 = vector.shape_cast %65 : vector<1xf32> to vector<1x1x1xf32>
    %67 = vector.extract %66[0, 0, 0] : f32 from vector<1x1x1xf32>
    %cst_8 = arith.constant 1.000000e+02 : f32
    %68 = arith.mulf %cst_8, %67 : f32
    %cst_9 = arith.constant 5.000000e-01 : f32
    %69 = arith.mulf %68, %cst_9 : f32
    %cst_10 = arith.constant 1.000000e+02 : f32
    %70 = arith.subf %cst_10, %69 : f32
    %71 = arith.subf %3, %8 : vector<16x1xf32>
    %72 = math.absf %71 : vector<16x1xf32>
    %73 = arith.subf %4, %9 : vector<16x1xf32>
    %74 = math.absf %73 : vector<16x1xf32>
    %75 = arith.addf %72, %74 : vector<16x1xf32>
    %76 = arith.subf %5, %10 : vector<16x1xf32>
    %77 = math.absf %76 : vector<16x1xf32>
    %78 = arith.addf %75, %77 : vector<16x1xf32>
    %79 = arith.subf %6, %11 : vector<16x1xf32>
    %80 = math.absf %79 : vector<16x1xf32>
    %81 = arith.addf %78, %80 : vector<16x1xf32>
    %82 = arith.mulf %30, %81 : vector<16x1xf32>
    %83 = vector.shape_cast %82 : vector<16x1xf32> to vector<1x16x1xf32>
    %cst_11 = arith.constant dense<0.000000e+00> : vector<1xf32>
    %84 = vector.multi_reduction <add>, %83, %cst_11 [1, 2] : vector<1x16x1xf32> to vector<1xf32>
    %85 = vector.shape_cast %84 : vector<1xf32> to vector<1x1x1xf32>
    %86 = vector.extract %85[0, 0, 0] : f32 from vector<1x1x1xf32>
    %cst_12 = arith.constant 5.000000e-01 : f32
    %87 = arith.mulf %86, %cst_12 : f32
    %cst_13 = arith.constant 5.000000e-01 : f32
    %88 = vector.broadcast %cst_13 : f32 to vector<16x1xf32>
    %89 = arith.mulf %88, %5 : vector<16x1xf32>
    %90 = arith.subf %3, %89 : vector<16x1xf32>
    %cst_14 = arith.constant 5.000000e-01 : f32
    %91 = vector.broadcast %cst_14 : f32 to vector<16x1xf32>
    %92 = arith.mulf %91, %5 : vector<16x1xf32>
    %93 = arith.addf %3, %92 : vector<16x1xf32>
    %cst_15 = arith.constant 5.000000e-01 : f32
    %94 = vector.broadcast %cst_15 : f32 to vector<16x1xf32>
    %95 = arith.mulf %94, %6 : vector<16x1xf32>
    %96 = arith.subf %4, %95 : vector<16x1xf32>
    %cst_16 = arith.constant 5.000000e-01 : f32
    %97 = vector.broadcast %cst_16 : f32 to vector<16x1xf32>
    %98 = arith.mulf %97, %6 : vector<16x1xf32>
    %99 = arith.addf %4, %98 : vector<16x1xf32>
    %cst_17 = arith.constant 5.000000e-01 : f32
    %100 = vector.broadcast %cst_17 : f32 to vector<16x1xf32>
    %101 = arith.mulf %100, %10 : vector<16x1xf32>
    %102 = arith.subf %8, %101 : vector<16x1xf32>
    %cst_18 = arith.constant 5.000000e-01 : f32
    %103 = vector.broadcast %cst_18 : f32 to vector<16x1xf32>
    %104 = arith.mulf %103, %10 : vector<16x1xf32>
    %105 = arith.addf %8, %104 : vector<16x1xf32>
    %cst_19 = arith.constant 5.000000e-01 : f32
    %106 = vector.broadcast %cst_19 : f32 to vector<16x1xf32>
    %107 = arith.mulf %106, %11 : vector<16x1xf32>
    %108 = arith.subf %9, %107 : vector<16x1xf32>
    %cst_20 = arith.constant 5.000000e-01 : f32
    %109 = vector.broadcast %cst_20 : f32 to vector<16x1xf32>
    %110 = arith.mulf %109, %11 : vector<16x1xf32>
    %111 = arith.addf %9, %110 : vector<16x1xf32>
    %112 = arith.subf %93, %90 : vector<16x1xf32>
    %113 = arith.subf %99, %96 : vector<16x1xf32>
    %114 = arith.mulf %112, %113 : vector<16x1xf32>
    %115 = arith.subf %105, %102 : vector<16x1xf32>
    %116 = arith.subf %111, %108 : vector<16x1xf32>
    %117 = arith.mulf %115, %116 : vector<16x1xf32>
    %118 = arith.minimumf %93, %105 : vector<16x1xf32>
    %119 = arith.maximumf %90, %102 : vector<16x1xf32>
    %120 = arith.subf %118, %119 : vector<16x1xf32>
    %cst_21 = arith.constant 0.000000e+00 : f32
    %121 = vector.broadcast %cst_21 : f32 to vector<16x1xf32>
    %122 = arith.maximumf %120, %121 : vector<16x1xf32>
    %123 = arith.minimumf %99, %111 : vector<16x1xf32>
    %124 = arith.maximumf %96, %108 : vector<16x1xf32>
    %125 = arith.subf %123, %124 : vector<16x1xf32>
    %cst_22 = arith.constant 0.000000e+00 : f32
    %126 = vector.broadcast %cst_22 : f32 to vector<16x1xf32>
    %127 = arith.maximumf %125, %126 : vector<16x1xf32>
    %128 = arith.mulf %122, %127 : vector<16x1xf32>
    %129 = arith.addf %114, %117 : vector<16x1xf32>
    %130 = arith.subf %129, %128 : vector<16x1xf32>
    %131 = arith.divf %128, %130 : vector<16x1xf32>
    %132 = arith.maximumf %93, %105 : vector<16x1xf32>
    %133 = arith.minimumf %90, %102 : vector<16x1xf32>
    %134 = arith.subf %132, %133 : vector<16x1xf32>
    %cst_23 = arith.constant 0.000000e+00 : f32
    %135 = vector.broadcast %cst_23 : f32 to vector<16x1xf32>
    %136 = arith.maximumf %134, %135 : vector<16x1xf32>
    %137 = arith.maximumf %99, %111 : vector<16x1xf32>
    %138 = arith.minimumf %96, %108 : vector<16x1xf32>
    %139 = arith.subf %137, %138 : vector<16x1xf32>
    %cst_24 = arith.constant 0.000000e+00 : f32
    %140 = vector.broadcast %cst_24 : f32 to vector<16x1xf32>
    %141 = arith.maximumf %139, %140 : vector<16x1xf32>
    %142 = arith.mulf %136, %141 : vector<16x1xf32>
    %143 = arith.subf %142, %130 : vector<16x1xf32>
    %144 = arith.divf %143, %142 : vector<16x1xf32>
    %145 = arith.subf %131, %144 : vector<16x1xf32>
    %cst_25 = arith.constant 1.000000e+00 : f32
    %146 = vector.broadcast %cst_25 : f32 to vector<16x1xf32>
    %147 = arith.subf %146, %145 : vector<16x1xf32>
    %148 = arith.mulf %30, %147 : vector<16x1xf32>
    %149 = vector.shape_cast %148 : vector<16x1xf32> to vector<1x16x1xf32>
    %cst_26 = arith.constant dense<0.000000e+00> : vector<1xf32>
    %150 = vector.multi_reduction <add>, %149, %cst_26 [1, 2] : vector<1x16x1xf32> to vector<1xf32>
    %151 = vector.shape_cast %150 : vector<1xf32> to vector<1x1x1xf32>
    %152 = vector.extract %151[0, 0, 0] : f32 from vector<1x1x1xf32>
    %cst_27 = arith.constant 5.000000e-01 : f32
    %153 = arith.mulf %152, %cst_27 : f32
    %154 = arith.mulf %30, %131 : vector<16x1xf32>
    %155 = vector.shape_cast %154 : vector<16x1xf32> to vector<1x16x1xf32>
    %cst_28 = arith.constant dense<0.000000e+00> : vector<1xf32>
    %156 = vector.multi_reduction <add>, %155, %cst_28 [1, 2] : vector<1x16x1xf32> to vector<1xf32>
    %157 = vector.shape_cast %156 : vector<1xf32> to vector<1x1x1xf32>
    %158 = vector.extract %157[0, 0, 0] : f32 from vector<1x1x1xf32>
    %cst_29 = arith.constant 5.000000e-01 : f32
    %159 = arith.mulf %158, %cst_29 : f32
    %cst_30 = arith.constant 1.000000e+00 : f32
    %160 = vector.broadcast %cst_30 : f32 to vector<16x1xf32>
    %161 = arith.subf %160, %131 : vector<16x1xf32>
    %162 = arith.mulf %161, %161 : vector<16x1xf32>
    %163 = arith.subf %7, %131 : vector<16x1xf32>
    %164 = arith.mulf %163, %163 : vector<16x1xf32>
    %165 = arith.mulf %162, %164 : vector<16x1xf32>
    %166 = arith.mulf %30, %165 : vector<16x1xf32>
    %167 = vector.shape_cast %166 : vector<16x1xf32> to vector<1x16x1xf32>
    %cst_31 = arith.constant dense<0.000000e+00> : vector<1xf32>
    %168 = vector.multi_reduction <add>, %167, %cst_31 [1, 2] : vector<1x16x1xf32> to vector<1xf32>
    %169 = vector.shape_cast %168 : vector<1xf32> to vector<1x1x1xf32>
    %170 = vector.extract %169[0, 0, 0] : f32 from vector<1x1x1xf32>
    %cst_32 = arith.constant 5.000000e-01 : f32
    %171 = arith.mulf %170, %cst_32 : f32
    %c0_33 = arith.constant 0 : index
    %172 = memref.load %arg2[%c0_33] : memref<8xf32, #tpu.memory_space<smem>>
    memref.store %57, %arg2[%c0_33] : memref<8xf32, #tpu.memory_space<smem>>
    %c1_34 = arith.constant 1 : index
    %173 = memref.load %arg2[%c1_34] : memref<8xf32, #tpu.memory_space<smem>>
    memref.store %70, %arg2[%c1_34] : memref<8xf32, #tpu.memory_space<smem>>
    %c2_35 = arith.constant 2 : index
    %174 = memref.load %arg2[%c2_35] : memref<8xf32, #tpu.memory_space<smem>>
    memref.store %87, %arg2[%c2_35] : memref<8xf32, #tpu.memory_space<smem>>
    %c3_36 = arith.constant 3 : index
    %175 = memref.load %arg2[%c3_36] : memref<8xf32, #tpu.memory_space<smem>>
    memref.store %153, %arg2[%c3_36] : memref<8xf32, #tpu.memory_space<smem>>
    %c4 = arith.constant 4 : index
    %176 = memref.load %arg2[%c4] : memref<8xf32, #tpu.memory_space<smem>>
    memref.store %159, %arg2[%c4] : memref<8xf32, #tpu.memory_space<smem>>
    %c5 = arith.constant 5 : index
    %177 = memref.load %arg2[%c5] : memref<8xf32, #tpu.memory_space<smem>>
    memref.store %171, %arg2[%c5] : memref<8xf32, #tpu.memory_space<smem>>
    %cst_37 = arith.constant 0.000000e+00 : f32
    %c6 = arith.constant 6 : index
    %178 = memref.load %arg2[%c6] : memref<8xf32, #tpu.memory_space<smem>>
    memref.store %cst_37, %arg2[%c6] : memref<8xf32, #tpu.memory_space<smem>>
    %cst_38 = arith.constant 0.000000e+00 : f32
    %c7 = arith.constant 7 : index
    %179 = memref.load %arg2[%c7] : memref<8xf32, #tpu.memory_space<smem>>
    memref.store %cst_38, %arg2[%c7] : memref<8xf32, #tpu.memory_space<smem>>
    return
  }
}

</mosaic_0001>

<bundles_post_ra>
// kernel: tpu_custom_call.1
= control target key start
LH: loop header
LB: loop body
LE: loop exit
PB: predicated region body
PF: predicated region fallthrough
CT: control target
= control target key end

     0   :  { %7 = vsyncpa [#allocation4], 0  ;;  %s781_s0 = inlined_call_operand.hbm [shape: s32[8], index: 0, kind: input, shape index: {}]   ;;  %s782_s1 = inlined_call_operand.hbm [shape: f32[16,128], index: 1, kind: input, shape index: {}]   ;;  %s783_s2 = inlined_call_operand.hbm [shape: f32[8], index: 2, kind: output, shape index: {}]  }
   0x1   :  { %8 = vsyncpa [#allocation3], 0 }
   0x2   :  { %9 = vsyncpa [#allocation5], 0  ;;  %s574_s9 = smov [#allocation2]   ;;  %s575_s12 = smov [#allocation6]  }
   0x3   :  { %17 = dma.hbm_to_smem %s781_s0, 16, %s574_s9, [#allocation4]  }
   0x4   :  { %s23_s13 = sshll.u32 %s575_s12, 4  ;;  %s24_s13 = int_to_ptr.vmem [resolvable:$true] %s23_s13 }
   0x5   :  { %s548_s14 = scalar_lea.vmem %s24_s13, 256  ;;  %p553_p1 = scmp.lt.s32.totalorder %s24_s13, %s24_s13 }
   0x6   :  { %p549_p0 = scmp.ne.s32.totalorder %s24_s13, %s548_s14  ;;  %p554_p2 = scmp.lt.s32.totalorder %s548_s14, %s548_s14 }
   0x8   :  { %p555_p3 = por %p554_p2, %p553_p1 }
   0xa   :  { %p556_p4 = pnand %p555_p3, %p549_p0 }
   0xc   :  { %559 = shalt.err (!%p556_p4)
}
   0xd   :  { %s576_s15 = smov 128   ;;  %s577_s16 = smov 8  }
   0xe   :  { %29 = dma.hbm_to_vmem [thread:$0]  %s782_s1, 256, %s24_s13, [#allocation3], %s576_s15, %s576_s15, %s577_s16  }
   0xf   :  { %568 = dma.done.wait [#allocation4], 16  }
  0x10   :  { %569 = vsyncadd [#allocation4], 4294967280 }
  0x11   :  { %570 = dma.done.wait [#allocation3], 256  }
  0x12   :  { %571 = vsyncadd [#allocation3], 4294967040 }
  0x13   :  { %36 = sfence }
  0x14   :  { %v611_v0 = vld [vmem:[#allocation6] sm:$0xff]  ;;  %v613_v1 = vld [vmem:[#allocation6 + $0x8] sm:$0xff]  ;;  %s578_s0 = smov 126   ;;  %s579_s1 = smov 123   ;;  %vm116_vm6 = vcmask 7168  }
  0x15   :  { %v245_v2 = vmul.f32 0.5, %v611_v0  ;;  %v246_v3 = vmul.f32 0.5, %v613_v1  ;;  %s580_s19 = smov 127   ;;  %s581_s20 = smov 4  }
  0x16   :  { %s582_s21 = smov 1   ;;  %s583_s22 = smov 125  }
  0x17   :  { %249 = vrot.lane.b32.xlu0 %v245_v2, %s578_s0  ;;  %s584_s23 = smov 124   ;;  %s42_s24 = sld [smem:[#allocation2]] }
  0x18   :  { %s475_s25 = sld [smem:[#allocation2 + $0x2]]  ;;  %s588_s30 = smov 0.0  }
  0x19   :  { %s476_s26 = sld [smem:[#allocation2 + $0x1]]  ;;  %s589_s17 = smov [#allocation7]  }
  0x1a   :  { %s477_s27 = sld [smem:[#allocation2 + $0x3]] }
  0x1b   :  { %251 = vrot.lane.b32.xlu0 %v246_v3, %s578_s0  ;;  %457 = sst [smem:[#allocation7 + $0x6]] %s588_s30 }
  0x1c   :  { %459 = sst [smem:[#allocation7 + $0x7]] %s588_s30 }
  0x89   :  { %v250_v4 = vpop.permute.xlu0 %249 }
  0x8a   :  { %v255_v5 = vsub.f32 %v611_v0, %v250_v4  ;;  %v257_v6 = vadd.f32 %v250_v4, %v611_v0 }
  0x8c   :  { %273 = vrot.lane.b32.xlu1 %v257_v6, %s579_s1  ;;  %283 = vrot.lane.b32.xlu0 %v255_v5, %s579_s1  ;;  %v259_v9 = vsub.f32 %v257_v6, %v255_v5 }
  0x8d   :  { %v252_v7 = vpop.permute.xlu0 %251 }
  0x8e   :  { %v258_v8 = vadd.f32 %v252_v7, %v613_v1  ;;  %v256_v10 = vsub.f32 %v613_v1, %v252_v7 }
  0x90   :  { %263 = vrot.lane.b32.xlu0 %v259_v9, %s580_s19  ;;  %275 = vrot.lane.b32.xlu1 %v258_v8, %s579_s1  ;;  %v260_v11 = vsub.f32 %v258_v8, %v256_v10 }
  0x94   :  { %285 = vrot.lane.b32.xlu1 %v256_v10, %s579_s1 }
  0x98   :  { %265 = vrot.lane.b32.xlu1 %v260_v11, %s580_s19 }
  0xfe   :  { %v274_v12 = vpop.permute.xlu1 %273  ;;  %v284_v13 = vpop.permute.xlu0 %283 }
  0xff   :  { %v279_v14 = vmin.f32 %v257_v6, %v274_v12  ;;  %v321_v15 = vmax.f32 %v257_v6, %v274_v12  ;;  %v289_v16 = vmax.f32 %v255_v5, %v284_v13  ;;  %v323_v17 = vmin.f32 %v255_v5, %v284_v13 }
 0x101   :  { %v291_v18 = vsub.f32 %v279_v14, %v289_v16  ;;  %v629_v19 = vsub.f32 %v321_v15, %v323_v17  ;;  %v43_v15 = vstv %s42_s24  ;;  %v47_v16 = vstv %s475_s25 }
 0x102   :  { %v276_v20 = vpop.permute.xlu1 %275  ;;  %v264_v22 = vpop.permute.xlu0 %263 }
 0x103   :  { %v293_v21 = vmax.f32 %v291_v18, 0.0  ;;  %v280_v23 = vmin.f32 %v258_v8, %v276_v20  ;;  %v322_v25 = vmax.f32 %v258_v8, %v276_v20  ;;  %v269_v26 = vmul.f32 %v264_v22, %v259_v9 }
 0x104   :  { %v327_v49 = vmax.f32 %v629_v19, 0.0  ;;  %v51_v18 = vstv %s476_s26  ;;  %v55_v22 = vstv %s477_s27 }
 0x105   :  { %297 = vrot.lane.b32.xlu0 %v293_v21, %s580_s19 }
 0x106   :  { %v286_v24 = vpop.permute.xlu1 %285 }
 0x107   :  { %v290_v27 = vmax.f32 %v256_v10, %v286_v24  ;;  %v324_v28 = vmin.f32 %v256_v10, %v286_v24  ;;  %v39_v10 = vlaneseq }
 0x109   :  { %v292_v29 = vsub.f32 %v280_v23, %v290_v27  ;;  %v632_v30 = vsub.f32 %v322_v25, %v324_v28  ;;  %307 = vrot.lane.b32.xlu0 %v269_v26, %s579_s1 }
 0x10a   :  { %v266_v32 = vpop.permute.xlu1 %265 }
 0x10b   :  { %v294_v31 = vmax.f32 %v292_v29, 0.0  ;;  %v270_v33 = vmul.f32 %v266_v32, %v260_v11  ;;  %v328_v53 = vmax.f32 %v632_v30, 0.0  ;;  %v40_v11 = vshrl.u32 %v39_v10, 7 }
 0x10d   :  { %299 = vrot.lane.b32.xlu1 %v294_v31, %s580_s19  ;;  %186 = vrot.lane.b32.xlu0 %v611_v0, %s579_s1  ;;  %v41_v14 = vadd.s32 8, %v40_v11  ;;  %vm693_vm0 = vcmp.eq.s32.totalorder %v40_v11, %v43_v15  ;;  %vm705_vm2 = vcmp.eq.s32.totalorder %v40_v11, %v51_v18 }
 0x10f   :  { %vm697_vm1 = vcmp.eq.s32.totalorder %v41_v14, %v43_v15  ;;  %vm709_vm3 = vcmp.eq.s32.totalorder %v41_v14, %v51_v18  ;;  %v587_v18 = vmov 0.0  }
 0x110   :  { %v49_v23 = vsel %vm697_vm1, %v47_v16, 1  ;;  %vm59_vm13 = vmor %vm697_vm1, %vm709_vm3 }
 0x111   :  { %309 = vrot.lane.b32.xlu1 %v270_v33, %s579_s1  ;;  %v57_v29 = vsel %vm709_vm3, %v55_v22, %v49_v23  ;;  %vm58_vm1 = vmor %vm693_vm0, %vm705_vm2 }
 0x112   :  { %vm111_vm5 = vcmp.eq.s32.totalorder %v57_v29, 1  ;;  %vm105_vm11 = vcmp.eq.s32.totalorder %v57_v29, 0 }
 0x115   :  { %188 = vrot.lane.b32.xlu1 %v613_v1, %s579_s1 }
 0x177   :  { %v298_v34 = vpop.permute.xlu0 %297 }
 0x178   :  { %v303_v36 = vmul.f32 %v298_v34, %v293_v21  ;;  %v48_v21 = vsel %vm693_vm0, %v47_v16, 1 }
 0x179   :  { %v715_v28 = vsel %vm705_vm2, %v55_v22, %v48_v21 }
 0x17a   :  { %vm110_vm4 = vcmp.eq.s32.totalorder %v715_v28, 1  ;;  %vm104_vm8 = vcmp.eq.s32.totalorder %v715_v28, 0 }
 0x17b   :  { %v308_v35 = vpop.permute.xlu0 %307 }
 0x17c   :  { %v313_v37 = vadd.f32 %v308_v35, %v269_v26  ;;  %v585_v35 = vmov 1.0  }
 0x17e   :  { %v641_v38 = vsub.f32 %v313_v37, %v303_v36  ;;  %v113_v37 = vsel %vm111_vm5, 0.0625, %v585_v35 }
 0x17f   :  { %v300_v39 = vpop.permute.xlu1 %299  ;;  %v187_v47 = vpop.permute.xlu0 %186 }
 0x180   :  { %514 = vrcp.f32 %v641_v38  ;;  %v304_v41 = vmul.f32 %v300_v39, %v294_v31  ;;  %v192_v50 = vsub.f32 %v611_v0, %v187_v47 }
 0x182   :  { %v660_v51 = vand.u32 2147483647, %v192_v50 }
 0x183   :  { %v310_v40 = vpop.permute.xlu1 %309 }
 0x184   :  { %v314_v42 = vadd.f32 %v310_v40, %v270_v33 }
 0x186   :  { %v644_v43 = vsub.f32 %v314_v42, %v304_v41 }
 0x187   :  { %v189_v52 = vpop.permute.xlu1 %188 }
 0x188   :  { %516 = vrcp.f32 %v644_v43  ;;  %v193_v54 = vsub.f32 %v613_v1, %v189_v52 }
 0x18a   :  { %v672_v55 = vand.u32 2147483647, %v193_v54 }
 0x18d   :  { %v515_v44 = vpop.eup %514 }
 0x18e   :  { %v647_v45 = vmul.f32 %v515_v44, %v303_v36  ;;  %v112_v36 = vsel %vm110_vm4, 0.0625, %v585_v35 }
 0x18f   :  { %v129_v44 = vsel %vm116_vm6, %v112_v36, 0.0 }
 0x190   :  { %401 = vrot.lane.b32.xlu0 %v647_v45, %s581_s20 }
 0x194   :  { %66 = vrot.lane.b32.xlu0 %v611_v0, %s580_s19 }
 0x195   :  { %v517_v46 = vpop.eup %516 }
 0x196   :  { %v652_v48 = vmul.f32 %v517_v46, %v304_v41  ;;  %v130_v46 = vsel %vm116_vm6, %v113_v37, 0.0 }
 0x198   :  { %403 = vrot.lane.b32.xlu1 %v652_v48, %s581_s20  ;;  %331 = vrot.lane.b32.xlu0 %v327_v49, %s580_s19 }
 0x19c   :  { %68 = vrot.lane.b32.xlu1 %v613_v1, %s580_s19  ;;  %145 = vrot.lane.b32.xlu0 %v611_v0, %s582_s21 }
 0x1a0   :  { %333 = vrot.lane.b32.xlu1 %v328_v53, %s580_s19  ;;  %198 = vrot.lane.b32.xlu0 %v660_v51, %s580_s19 }
 0x1a4   :  { %147 = vrot.lane.b32.xlu1 %v613_v1, %s582_s21  ;;  %206 = vrot.lane.b32.xlu0 %v660_v51, %s578_s0 }
 0x1a8   :  { %200 = vrot.lane.b32.xlu1 %v672_v55, %s580_s19  ;;  %214 = vrot.lane.b32.xlu0 %v660_v51, %s583_s22 }
 0x1ac   :  { %208 = vrot.lane.b32.xlu1 %v672_v55, %s578_s0 }
 0x1b0   :  { %216 = vrot.lane.b32.xlu1 %v672_v55, %s583_s22 }
 0x202   :  { %v402_v56 = vpop.permute.xlu0 %401 }
 0x203   :  { %v407_v57 = vsub.f32 %v611_v0, %v402_v56  ;;  %v131_v56 = vadd.f32 %v130_v46, %v129_v44 }
 0x205   :  { %v409_v58 = vmul.f32 %v407_v57, %v407_v57 }
 0x206   :  { %v684_v59 = vpop.permute.xlu0 %66 }
 0x207   :  { %v74_v60 = vsub.f32 %v611_v0, %v684_v59  ;;  %413 = vrot.lane.b32.xlu0 %v409_v58, %s584_s23  ;;  %v72_v57 = vmax.f32 %v611_v0, %v684_v59 }
 0x209   :  { %v76_v61 = vand.u32 2147483647, %v74_v60 }
 0x20a   :  { %v404_v62 = vpop.permute.xlu1 %403  ;;  %v332_v11 = vpop.permute.xlu0 %331 }
 0x20b   :  { %v78_v63 = vsub.f32 0.0, %v76_v61  ;;  %v408_v2 = vsub.f32 %v613_v1, %v404_v62  ;;  %v106_v62 = vsel %vm104_vm8, %v611_v0, %v684_v59  ;;  %v337_v16 = vmul.f32 %v332_v11, %v327_v49 }
 0x20d   :  { %v80_v3 = vmul.f32 1.442695, %v78_v63  ;;  %v410_v4 = vmul.f32 %v408_v2, %v408_v2 }
 0x20e   :  { %v689_v5 = vpop.permute.xlu1 %68  ;;  %v146_v27 = vpop.permute.xlu0 %145 }
 0x20f   :  { %518 = vpow2.f32 %v80_v3  ;;  %v75_v6 = vsub.f32 %v613_v1, %v689_v5  ;;  %415 = vrot.lane.b32.xlu1 %v410_v4, %s584_s23  ;;  %v73_v3 = vmax.f32 %v613_v1, %v689_v5  ;;  %vm151_vm14 = vcmp.gt.f32.partialorder %v611_v0, %v146_v27 }
 0x211   :  { %v77_v7 = vand.u32 2147483647, %v75_v6  ;;  %v586_v6 = vmov 0  }
 0x212   :  { %v334_v33 = vpop.permute.xlu1 %333  ;;  %v199_v49 = vpop.permute.xlu0 %198 }
 0x213   :  { %v79_v8 = vsub.f32 0.0, %v77_v7  ;;  %v338_v39 = vmul.f32 %v334_v33, %v328_v53  ;;  %v153_v33 = vsel %vm151_vm14, 1, %v586_v6 }
 0x214   :  { %vm155_vm15 = vcmp.eq.s32.totalorder %v153_v33, %v715_v28 }
 0x215   :  { %v82_v9 = vmul.f32 1.442695, %v79_v8  ;;  %v340_v59 = vsub.f32 %v338_v39, %v644_v43  ;;  %v480_v0 = vsel %vm155_vm15, 1.0, %v587_v18 }
 0x216   :  { %v148_v50 = vpop.permute.xlu1 %147  ;;  %v207_v35 = vpop.permute.xlu0 %206 }
 0x217   :  { %520 = vpow2.f32 %v82_v9  ;;  %vm152_vm10 = vcmp.gt.f32.partialorder %v613_v1, %v148_v50  ;;  %v107_v9 = vsel %vm105_vm11, %v613_v1, %v689_v5 }
 0x218   :  { %v154_v7 = vsel %vm152_vm10, 1, %v586_v6 }
 0x219   :  { %vm156_vm12 = vcmp.eq.s32.totalorder %v154_v7, %v57_v29 }
 0x21a   :  { %v201_v60 = vpop.permute.xlu1 %200  ;;  %v481_v21 = vsel %vm156_vm12, 1.0, %v587_v18  ;;  %v215_v44 = vpop.permute.xlu0 %214 }
 0x21b   :  { %v205_v5 = vadd.f32 %v201_v60, %v672_v55 }
 0x21c   :  { %v519_v12 = vpop.eup %518 }
 0x21d   :  { %v84_v13 = vadd.f32 1.0, %v519_v12  ;;  %v87_v24 = vmul.f32 -0.5, %v519_v12  ;;  %v90_v34 = vand.u32 2147483647, %v519_v12 }
 0x21e   :  { %v209_v10 = vpop.permute.xlu1 %208 }
 0x21f   :  { %522 = vlog2.f32 %v84_v13  ;;  %v88_v32 = vadd.f32 1.0, %v87_v24  ;;  %vm91_vm7 = vcmp.lt.f32.partialorder %v90_v34, 0.0004427343  ;;  %v479_v24 = vsel %vm59_vm13, 1.0, %v587_v18 }
 0x220   :  { %v213_v29 = vadd.f32 %v209_v10, %v205_v5  ;;  %v162_v20 = vmul.f32 %v481_v21, %v479_v24 }
 0x221   :  { %v89_v40 = vmul.f32 %v519_v12, %v88_v32 }
 0x222   :  { %v217_v43 = vpop.permute.xlu1 %216 }
 0x224   :  { %v521_v25 = vpop.eup %520 }
 0x225   :  { %v93_v31 = vadd.f32 1.0, %v521_v25  ;;  %v96_v41 = vmul.f32 -0.5, %v521_v25  ;;  %v99_v58 = vand.u32 2147483647, %v521_v25 }
 0x227   :  { %524 = vlog2.f32 %v93_v31  ;;  %v97_v54 = vadd.f32 1.0, %v96_v41  ;;  %vm100_vm9 = vcmp.lt.f32.partialorder %v99_v58, 0.0004427343  ;;  %v221_v31 = vadd.f32 %v217_v43, %v213_v29 }
 0x228   :  { %526 = vrcp.f32 %v338_v39  ;;  %v339_v39 = vsub.f32 %v337_v16, %v641_v38  ;;  %v204_v41 = vadd.f32 %v199_v49, %v660_v51  ;;  %v395_v51 = vsub.f32 1.0, %v647_v45 }
 0x229   :  { %v98_v53 = vmul.f32 %v521_v25, %v97_v54  ;;  %528 = vrcp.f32 %v337_v16  ;;  %v223_v32 = vmul.f32 %v479_v24, %v221_v31 }
 0x22a   :  { %v212_v46 = vadd.f32 %v207_v35, %v204_v41  ;;  %v397_v54 = vmul.f32 %v395_v51, %v395_v51 }
 0x22c   :  { %v523_v42 = vpop.eup %522 }
 0x22d   :  { %v86_v47 = vmul.f32 0.6931472, %v523_v42  ;;  %v478_v42 = vsel %vm58_vm1, 1.0, %v587_v18 }
 0x22e   :  { %v161_v28 = vmul.f32 %v480_v0, %v478_v42 }
 0x22f   :  { %v92_v52 = vsel %vm91_vm7, %v89_v40, %v86_v47  ;;  %v220_v47 = vadd.f32 %v215_v44, %v212_v46 }
 0x230   :  { %v102_v30 = vadd.f32 %v92_v52, %v72_v57  ;;  %v372_v52 = vmul.f32 %v478_v42, %v647_v45 }
 0x231   :  { %v222_v38 = vmul.f32 %v478_v42, %v220_v47 }
 0x232   :  { %v108_v2 = vsub.f32 %v102_v30, %v106_v62  ;;  %v396_v30 = vsub.f32 1.0, %v652_v48 }
 0x233   :  { %132 = vadd.xlane.f32.xlu1 %v131_v56 }
 0x234   :  { %v525_v61 = vpop.eup %524  ;;  %v114_v13 = vmul.f32 %v112_v36, %v108_v2 }
 0x235   :  { %v95_v63 = vmul.f32 0.6931472, %v525_v61  ;;  %v527_v14 = vpop.eup %526 }
 0x236   :  { %v344_v1 = vmul.f32 %v527_v14, %v340_v59  ;;  %v117_v22 = vsel %vm116_vm6, %v114_v13, 0.0  ;;  %v529_v36 = vpop.eup %528 }
 0x237   :  { %v101_v4 = vsel %vm100_vm9, %v98_v53, %v95_v63  ;;  %v342_v40 = vmul.f32 %v529_v36, %v339_v39  ;;  %v398_v53 = vmul.f32 %v396_v30, %v396_v30 }
 0x238   :  { %v103_v8 = vadd.f32 %v101_v4, %v73_v3  ;;  %v346_v19 = vsub.f32 %v652_v48, %v344_v1 }
 0x239   :  { %v345_v50 = vsub.f32 %v647_v45, %v342_v40 }
 0x23a   :  { %v109_v12 = vsub.f32 %v103_v8, %v107_v9  ;;  %v348_v55 = vsub.f32 1.0, %v346_v19 }
 0x23b   :  { %v347_v26 = vsub.f32 1.0, %v345_v50 }
 0x23c   :  { %v115_v15 = vmul.f32 %v113_v37, %v109_v12  ;;  %v350_v34 = vmul.f32 %v479_v24, %v348_v55  ;;  %v373_v37 = vmul.f32 %v479_v24, %v652_v48 }
 0x23d   :  { %v349_v17 = vmul.f32 %v478_v42, %v347_v26 }
 0x23e   :  { %v118_v23 = vsel %vm116_vm6, %v115_v15, 0.0 }
 0x23f   :  { %v119_v25 = vadd.f32 %v118_v23, %v117_v22 }
 0x241   :  { %120 = vadd.xlane.f32.xlu0 %v119_v25 }
 0x244   :  { %167 = vrot.lane.b32.xlu1 %v162_v20, %s580_s19 }
 0x248   :  { %228 = vrot.lane.b32.xlu1 %v223_v32, %s578_s0 }
 0x24c   :  { %355 = vrot.lane.b32.xlu1 %v350_v34, %s578_s0 }
 0x250   :  { %378 = vrot.lane.b32.xlu1 %v373_v37, %s578_s0 }
 0x257   :  { %165 = vrot.lane.b32.xlu0 %v161_v28, %s580_s19 }
 0x25b   :  { %226 = vrot.lane.b32.xlu0 %v222_v38, %s578_s0 }
 0x25f   :  { %353 = vrot.lane.b32.xlu0 %v349_v17, %s578_s0 }
 0x263   :  { %376 = vrot.lane.b32.xlu0 %v372_v52, %s578_s0 }
 0x279   :  { %v414_v56 = vpop.permute.xlu0 %413 }
 0x27a   :  { %v419_v57 = vmul.f32 %v414_v56, %v397_v54 }
 0x27c   :  { %v421_v58 = vmul.f32 %v478_v42, %v419_v57 }
 0x27e   :  { %425 = vrot.lane.b32.xlu0 %v421_v58, %s578_s0 }
 0x281   :  { %v416_v60 = vpop.permute.xlu1 %415 }
 0x282   :  { %v420_v61 = vmul.f32 %v416_v60, %v398_v53 }
 0x284   :  { %v422_v62 = vmul.f32 %v479_v24, %v420_v61 }
 0x286   :  { %427 = vrot.lane.b32.xlu1 %v422_v62, %s578_s0 }
 0x2bc   :  { %v133_v63 = vpop.xlane.xlu1 %132 }
 0x2bd   :  { %v134_v2 = vrot.slane %v133_v63, 4 }
 0x2bf   :  { %v135_v3 = vadd.f32 %v134_v2, %v133_v63 }
 0x2c0   :  { %v168_v4 = vpop.permute.xlu1 %167 }
 0x2c1   :  { %v136_v6 = vrot.slane %v135_v3, 2  ;;  %v172_v10 = vsel %vm116_vm6, %v168_v4, 0.0 }
 0x2c3   :  { %v137_v9 = vadd.f32 %v136_v6, %v135_v3 }
 0x2c4   :  { %v229_v8 = vpop.permute.xlu1 %228 }
 0x2c5   :  { %v138_v59 = vrot.slane %v137_v9, 1  ;;  %v233_v21 = vsel %vm116_vm6, %v229_v8, 0.0 }
 0x2c7   :  { %v139_v23 = vadd.f32 %v138_v59, %v137_v9 }
 0x2c8   :  { %v356_v16 = vpop.permute.xlu1 %355 }
 0x2c9   :  { %v360_v25 = vsel %vm116_vm6, %v356_v16, 0.0 }
 0x2ca   :  { %v121_v45 = vpop.xlane.xlu0 %120 }
 0x2cb   :  { %v122_v7 = vrot.slane %v121_v45, 4 }
 0x2cc   :  { %v379_v29 = vpop.permute.xlu1 %378 }
 0x2cd   :  { %v123_v48 = vadd.f32 %v122_v7, %v121_v45  ;;  %v383_v19 = vsel %vm116_vm6, %v379_v29, 0.0 }
 0x2ce   :  { %v166_v11 = vpop.permute.xlu0 %165 }
 0x2cf   :  { %v124_v12 = vrot.slane %v123_v48, 2  ;;  %v171_v13 = vsel %vm116_vm6, %v166_v11, 0.0 }
 0x2d0   :  { %v173_v14 = vadd.f32 %v172_v10, %v171_v13 }
 0x2d1   :  { %v125_v15 = vadd.f32 %v124_v12, %v123_v48 }
 0x2d2   :  { %v227_v18 = vpop.permute.xlu0 %226  ;;  %174 = vadd.xlane.f32.xlu0 %v173_v14 }
 0x2d3   :  { %v232_v1 = vsel %vm116_vm6, %v227_v18, 0.0  ;;  %v126_v5 = vrot.slane %v125_v15, 1 }
 0x2d4   :  { %v234_v22 = vadd.f32 %v233_v21, %v232_v1 }
 0x2d5   :  { %v127_v24 = vadd.f32 %v126_v5, %v125_v15 }
 0x2d6   :  { %235 = vadd.xlane.f32.xlu1 %v234_v22  ;;  %v354_v43 = vpop.permute.xlu0 %353 }
 0x2d7   :  { %v359_v27 = vsel %vm116_vm6, %v354_v43, 0.0  ;;  %482 = vpush %v127_v24 }
 0x2d8   :  { %484 = vpush %v139_v23  ;;  %v361_v20 = vadd.f32 %v360_v25, %v359_v27 }
 0x2da   :  { %362 = vadd.xlane.f32.xlu0 %v361_v20  ;;  %v377_v31 = vpop.permute.xlu0 %376 }
 0x2db   :  { %v382_v49 = vsel %vm116_vm6, %v377_v31, 0.0 }
 0x2dc   :  { %v384_v32 = vadd.f32 %v383_v19, %v382_v49 }
 0x2de   :  { %385 = vadd.xlane.f32.xlu0 %v384_v32 }
 0x2f0   :  { %v426_v55 = vpop.permute.xlu0 %425 }
 0x2f1   :  { %v431_v34 = vsel %vm116_vm6, %v426_v55, 0.0 }
 0x2f8   :  { %v428_v33 = vpop.permute.xlu1 %427 }
 0x2f9   :  { %v432_v35 = vsel %vm116_vm6, %v428_v33, 0.0 }
 0x2fa   :  { %v433_v36 = vadd.f32 %v432_v35, %v431_v34 }
 0x2fc   :  { %434 = vadd.xlane.f32.xlu1 %v433_v36 }
 0x308   :  { %s483_s28 = spop %482 }
 0x309   :  { %s485_s29 = spop %484 }
 0x30a   :  { %v141_v37 = vstv %s485_s29 }
 0x30b   :  { %530 = vrcp.f32 %v141_v37 }
 0x318   :  { %v531_v39 = vpop.eup %530 }
 0x319   :  { %486 = vpush %v531_v39 }
 0x34a   :  { %s487_s3 = spop %486 }
 0x34b   :  { %s144_s4 = smul.f32 %s487_s3, %s483_s28 }
 0x34d   :  { %445 = sst [smem:[#allocation7]] %s144_s4 }
 0x35b   :  { %v175_v0 = vpop.xlane.xlu0 %174 }
 0x35c   :  { %v176_v40 = vrot.slane %v175_v0, 4 }
 0x35e   :  { %v177_v41 = vadd.f32 %v176_v40, %v175_v0 }
 0x35f   :  { %v236_v42 = vpop.xlane.xlu1 %235 }
 0x360   :  { %v237_v44 = vrot.slane %v236_v42, 4  ;;  %v178_v46 = vrot.slane %v177_v41, 2 }
 0x362   :  { %v238_v28 = vadd.f32 %v237_v44, %v236_v42  ;;  %v179_v47 = vadd.f32 %v178_v46, %v177_v41 }
 0x363   :  { %v363_v50 = vpop.xlane.xlu0 %362 }
 0x364   :  { %v239_v38 = vrot.slane %v238_v28, 2  ;;  %v364_v26 = vrot.slane %v363_v50, 4  ;;  %v180_v17 = vrot.slane %v179_v47, 1 }
 0x366   :  { %v365_v52 = vadd.f32 %v364_v26, %v363_v50  ;;  %v181_v51 = vadd.f32 %v180_v17, %v179_v47  ;;  %v240_v54 = vadd.f32 %v239_v38, %v238_v28 }
 0x367   :  { %v386_v56 = vpop.xlane.xlu0 %385 }
 0x368   :  { %v366_v57 = vrot.slane %v365_v52, 2  ;;  %v387_v58 = vrot.slane %v386_v56, 4  ;;  %488 = vpush %v181_v51  ;;  %v241_v30 = vrot.slane %v240_v54, 1 }
 0x36a   :  { %v388_v53 = vadd.f32 %v387_v58, %v386_v56  ;;  %v242_v60 = vadd.f32 %v241_v30, %v240_v54  ;;  %v367_v61 = vadd.f32 %v366_v57, %v365_v52 }
 0x36c   :  { %v389_v62 = vrot.slane %v388_v53, 2  ;;  %490 = vpush %v242_v60  ;;  %v368_v63 = vrot.slane %v367_v61, 1 }
 0x36e   :  { %v390_v2 = vadd.f32 %v389_v62, %v388_v53  ;;  %v369_v3 = vadd.f32 %v368_v63, %v367_v61 }
 0x370   :  { %492 = vpush %v369_v3  ;;  %v391_v4 = vrot.slane %v390_v2, 1 }
 0x372   :  { %v392_v6 = vadd.f32 %v391_v4, %v390_v2 }
 0x374   :  { %494 = vpush %v392_v6 }
 0x385   :  { %v435_v45 = vpop.xlane.xlu1 %434 }
 0x386   :  { %v436_v7 = vrot.slane %v435_v45, 4 }
 0x388   :  { %v437_v8 = vadd.f32 %v436_v7, %v435_v45 }
 0x38a   :  { %v438_v9 = vrot.slane %v437_v8, 2 }
 0x38c   :  { %v439_v10 = vadd.f32 %v438_v9, %v437_v8 }
 0x38e   :  { %v440_v48 = vrot.slane %v439_v10, 1 }
 0x390   :  { %v441_v11 = vadd.f32 %v440_v48, %v439_v10 }
 0x392   :  { %496 = vpush %v441_v11 }
 0x399   :  { %s489_s5 = spop %488 }
 0x39a   :  { %s183_s6 = smul.f32 100.0, %s489_s5 }
 0x39c   :  { %s184_s7 = smul.f32 0.5, %s183_s6 }
 0x39d   :  { %s491_s8 = spop %490 }
 0x39e   :  { %s185_s9 = ssub.f32 100.0, %s184_s7  ;;  %s244_s10 = smul.f32 0.5, %s491_s8 }
 0x3a0   :  { %447 = sst [smem:[#allocation7 + $0x1]] %s185_s9 }
 0x3a1   :  { %449 = sst [smem:[#allocation7 + $0x2]] %s244_s10  ;;  %s493_s11 = spop %492 }
 0x3a2   :  { %s371_s12 = smul.f32 0.5, %s493_s11 }
 0x3a4   :  { %451 = sst [smem:[#allocation7 + $0x3]] %s371_s12 }
 0x3a5   :  { %s495_s13 = spop %494 }
 0x3a6   :  { %s394_s14 = smul.f32 0.5, %s495_s13 }
 0x3a8   :  { %453 = sst [smem:[#allocation7 + $0x4]] %s394_s14 }
 0x3c3   :  { %s497_s15 = spop %496 }
 0x3c4   :  { %s443_s16 = smul.f32 0.5, %s497_s15 }
 0x3c6   :  { %455 = sst [smem:[#allocation7 + $0x5]] %s443_s16 }
 0x3c7   :  { %467 = dma.smem_to_hbm %s589_s17, 16, %s783_s2, [#allocation5]  }
 0x3c8   :  { %572 = dma.done.wait [#allocation5], 16  }
 0x3c9   :  { %573 = vsyncadd [#allocation5], 4294967280 }
 0x3ca   :  { %471 = sfence }
 0x3cb   :  { %472 = vsyncpa [#allocation3], 1 }
 0x3cc   :  { %473 = vsyncpa [#allocation4], 1 }
 0x3cd   :  { %474 = vsyncpa [#allocation5], 1 }

</bundles_post_ra>
